<compile_context>
chip_gen: v7x
topology: tpu7x:2x2x1
jax: 0.10.0
libtpu: 0.0.40
codegen_flags: <defaults>
</compile_context>

<pallas_src>
import jax
import jax.numpy as jnp
from jax.experimental import pallas as pl
from jax.experimental.pallas import tpu as pltpu


def _beta_kernel(x_ref, b_ref, o_ref):
    # b_ref is either (row_tile, 1) or (1, lane_tile) float32; numpy-style
    # broadcasting in the add covers both. The cast + add is free filler in
    # the DMA shadow (the kernel is HBM-bound).
    o_ref[...] = x_ref[...] + b_ref[...].astype(x_ref.dtype)


def _cdiv(a, b):
    return (a + b - 1) // b


def _round_up(a, m):
    return ((a + m - 1) // m) * m


def _choose_tiles(R, L, itemsize):
    """Pick (row_tile, lane_tile, sublane_pack) for a (R, L) 2-D stream."""
    sub = max(8, 32 // itemsize)          # sublane packing: 8 f32, 16 bf16, 32 int8
    target = 8 * 1024 * 1024              # ~8 MiB x-block: near-roofline on all gens

    # Lane tile: keep the full lane extent when a `sub`-row slab fits the
    # budget; otherwise tile lanes in multiples of 128 (partial edge is fine).
    if L * itemsize * sub <= target:
        lane_tile = L
    else:
        lane_tile = max(128, ((target // (sub * itemsize)) // 128) * 128)

    # Row tile: multiple of the dtype's sublane packing; cap it so the padded
    # (row_tile, 1)->(row_tile, 128) beta column stays a small VMEM fraction.
    rows_fit = max(1, target // (lane_tile * itemsize))
    row_tile = max(sub, (rows_fit // sub) * sub)
    row_tile = min(row_tile, 8192)
    if row_tile >= R:
        row_tile = R                       # full extent: legal for any R

    # If everything collapsed into a single block, split the rows in two so
    # both v7x TensorCores get work (only when a legal split exists).
    if _cdiv(R, row_tile) * _cdiv(L, lane_tile) == 1 and R >= 2 * sub:
        half = _round_up(_cdiv(R, 2), sub)
        if half < R:
            row_tile = half

    return row_tile, lane_tile


def beta_forward(x: jax.Array, beta: jax.Array) -> jax.Array:
    """Computes x + beta with beta shaped (1, C, 1, 1), like the PyTorch Beta module."""
    N, C, H, W = x.shape
    HW = H * W
    itemsize = jnp.dtype(x.dtype).itemsize

    if HW >= 128:
        # Lane-dense (N*C, H*W) view + per-row f32 beta column (row r -> channel r % C).
        R, L = N * C, HW
        x2 = x.reshape(R, L)
        b2 = jnp.broadcast_to(
            beta.reshape(1, C).astype(jnp.float32), (N, C)
        ).reshape(R, 1)
        beta_is_column = True
    else:
        # HW too narrow for full-lane stores: repack as (N, C*H*W) with a
        # per-lane f32 beta row (lane-dense as long as C*H*W >= 128).
        R, L = N, C * HW
        x2 = x.reshape(R, L)
        b2 = jnp.broadcast_to(
            beta.reshape(C, 1).astype(jnp.float32), (C, HW)
        ).reshape(1, L)
        beta_is_column = False

    row_tile, lane_tile = _choose_tiles(R, L, itemsize)
    grid = (_cdiv(R, row_tile), _cdiv(L, lane_tile))

    if beta_is_column:
        b_spec = pl.BlockSpec((row_tile, 1), lambda i, j: (i, 0))
        b_pad_bytes = _round_up(row_tile, 8) * 128 * 4     # padded to 128 lanes
    else:
        b_spec = pl.BlockSpec((1, lane_tile), lambda i, j: (0, j))
        b_pad_bytes = 8 * _round_up(lane_tile, 128) * 4    # padded to 8 sublanes

    # Live VMEM: double-buffered x-in + out (4 x-blocks) + 2 beta blocks + slack.
    x_block_bytes = row_tile * lane_tile * itemsize
    vmem_limit = int(
        min(
            48 * 1024 * 1024,
            max(16 * 1024 * 1024, 4 * x_block_bytes + 2 * b_pad_bytes + 2 * 1024 * 1024),
        )
    )

    out2 = pl.pallas_call(
        _beta_kernel,
        out_shape=jax.ShapeDtypeStruct((R, L), x.dtype),
        grid_spec=pltpu.PrefetchScalarGridSpec(
            num_scalar_prefetch=0,
            grid=grid,
            in_specs=[
                pl.BlockSpec((row_tile, lane_tile), lambda i, j: (i, j)),  # x block
                b_spec,                                                    # beta block
            ],
            out_specs=pl.BlockSpec((row_tile, lane_tile), lambda i, j: (i, j)),
        ),
        compiler_params=pltpu.CompilerParams(
            dimension_semantics=("parallel", "parallel"),
            vmem_limit_bytes=vmem_limit,
        ),
        # input_output_aliases={0: 0} only if the caller donates x.
    )(x2, b2)

    return out2.reshape(N, C, H, W)


if __name__ == "__main__":
    key = jax.random.PRNGKey(0)
    kx, _ = jax.random.split(key)

    # Module fixes C = 3 (beta = zeros(3).view(1, -1, 1, 1)).
    N, C, H, W = 2, 3, 16, 16
    x = jax.random.normal(kx, (N, C, H, W), dtype=jnp.float32)

    # Deterministic parameter values. The PyTorch module initializes beta to
    # zeros; use small nonzero values here so the broadcast-add is exercised.
    beta = (jnp.arange(C, dtype=jnp.float32) * 0.5 - 0.5).reshape(1, C, 1, 1)

    out = beta_forward(x, beta)
    out = jax.block_until_ready(out)

    # Reference check in plain JAX (same broadcasting semantics as PyTorch).
    ref = x + beta
    assert out.shape == x.shape and out.dtype == x.dtype
    assert jnp.allclose(out, ref, atol=1e-6, rtol=1e-6)

    print("KERNEL_OK")
</pallas_src>

<mosaic_0001>
module attributes {stable_mosaic.version = 11 : i64} {
  func.func @_beta_kernel(%arg0: i32, %arg1: i32, %arg2: memref<6x256xf32, #tpu.memory_space<vmem>>, %arg3: memref<6x1xf32, #tpu.memory_space<vmem>>, %arg4: memref<6x256xf32, #tpu.memory_space<vmem>>) attributes {dimension_semantics = [#tpu.dimension_semantics<parallel>, #tpu.dimension_semantics<parallel>], iteration_bounds = array<i64: 1, 1>, scalar_prefetch = 0 : i64, scratch_operands = 0 : i64, tpu.core_type = #tpu.core_type<tc>, window_params = [{transform_indices = @transform_0, window_bounds = array<i64: 6, 256>}, {transform_indices = @transform_1, window_bounds = array<i64: 6, 1>}, {transform_indices = @transform_2, window_bounds = array<i64: 6, 256>}]} {
    %c0 = arith.constant 0 : index
    %c0_0 = arith.constant 0 : index
    %0 = vector.load %arg2[%c0, %c0_0] : memref<6x256xf32, #tpu.memory_space<vmem>>, vector<6x256xf32>
    %c0_1 = arith.constant 0 : index
    %c0_2 = arith.constant 0 : index
    %1 = vector.load %arg3[%c0_1, %c0_2] : memref<6x1xf32, #tpu.memory_space<vmem>>, vector<6x1xf32>
    %2 = vector.broadcast %1 : vector<6x1xf32> to vector<6x256xf32>
    %3 = arith.addf %0, %2 : vector<6x256xf32>
    %c0_3 = arith.constant 0 : index
    %c0_4 = arith.constant 0 : index
    %4 = vector.load %arg4[%c0_3, %c0_4] : memref<6x256xf32, #tpu.memory_space<vmem>>, vector<6x256xf32>
    tpu.vector_store %arg4[%c0_3, %c0_4], %3 {strides = array<i32>} : memref<6x256xf32, #tpu.memory_space<vmem>>, vector<6x256xf32>,
    return
  }
  func.func @transform_0(%arg0: i32, %arg1: i32) -> (i32, i32) {
    %c0_i32 = arith.constant 0 : i32
    return %arg0, %arg1 : i32, i32
  }
  func.func @transform_1(%arg0: i32, %arg1: i32) -> (i32, i32) {
    %c0_i32 = arith.constant 0 : i32
    %c0_i32_0 = arith.constant 0 : i32
    return %arg0, %c0_i32 : i32, i32
  }
  func.func @transform_2(%arg0: i32, %arg1: i32) -> (i32, i32) {
    %c0_i32 = arith.constant 0 : i32
    return %arg0, %arg1 : i32, i32
  }
}

</mosaic_0001>

<bundles_post_ra>
// kernel: tpu_custom_call.1
= control target key start
LH: loop header
LB: loop body
LE: loop exit
PB: predicated region body
PF: predicated region fallthrough
CT: control target
= control target key end

     0   :  { %7 = vsyncpa [#allocation3], 0  ;;  %s148_s0 = inlined_call_operand.hbm [shape: f32[6,256], index: 0, kind: input, shape index: {}]   ;;  %s149_s1 = inlined_call_operand.vmem [shape: f32[6,1], index: 1, kind: input, shape index: {}]   ;;  %s150_s2 = inlined_call_operand.hbm [shape: f32[6,256], index: 2, kind: output, shape index: {}]  }
   0x1   :  { %8 = vsyncpa [#allocation4], 0  ;;  %s103_s9 = smov [#allocation2]   ;;  %s55_s13 = scalar_lea.hbm %s148_s0, 256 }
   0x2   :  { %s15_s10 = sshll.u32 %s103_s9, 4  ;;  %p56_p0 = scmp.ne.s32.totalorder %s148_s0, %s55_s13  ;;  %s16_s10 = int_to_ptr.vmem [resolvable:$true] %s15_s10 }
   0x3   :  { %p59_p1 = scmp.lt.u32.totalorder %s55_s13, %s148_s0 }
   0x5   :  { %p61_p2 = pnand %p59_p1, %p56_p0 }
   0x7   :  { %64 = shalt.err (!%p61_p2)
}
   0x8   :  { %s65_s18 = scalar_lea.vmem %s16_s10, 256  ;;  %p70_p4 = scmp.lt.s32.totalorder %s16_s10, %s16_s10 }
   0x9   :  { %p66_p3 = scmp.ne.s32.totalorder %s16_s10, %s65_s18  ;;  %p71_p5 = scmp.lt.s32.totalorder %s65_s18, %s65_s18 }
   0xb   :  { %p72_p6 = por %p71_p5, %p70_p4 }
   0xd   :  { %p73_p7 = pnand %p72_p6, %p66_p3 }
   0xf   :  { %76 = shalt.err (!%p73_p7)
}
  0x10   :  { %18 = dma.hbm_to_vmem [thread:$0]  %s148_s0, 256, %s16_s10, [#allocation3]  }
  0x11   :  { %99 = dma.done.wait [#allocation3], 256  }
  0x12   :  { %100 = vsyncadd [#allocation3], 4294967040  ;;  %v104_v0 = vmov 0   ;;  %v26_v1 = vld [vmem:[%s149_s1] sm:$0x3f]  ;;  %s105_s23 = smov [#allocation5]  }
  0x13   :  { %54 = vset.pattern.permute.xlu0 %v104_v0  ;;  %v24_v2 = vld [vmem:[#allocation2] sm:$0x3f]  ;;  %v25_v3 = vld [vmem:[#allocation2 + $0x8] sm:$0x3f]  ;;  %s42_s24 = sshll.u32 %s105_s23, 4  ;;  %s43_s24 = int_to_ptr.vmem [resolvable:$true] %s42_s24 }
  0x14   :  { %29 = vperm.xlu0 %54, %v26_v1   ;;  %s77_s0 = scalar_lea.vmem %s43_s24, 256  ;;  %p82_p9 = scmp.lt.s32.totalorder %s43_s24, %s43_s24 }
  0x15   :  { %p78_p8 = scmp.ne.s32.totalorder %s43_s24, %s77_s0  ;;  %p83_p10 = scmp.lt.s32.totalorder %s77_s0, %s77_s0 }
  0x17   :  { %p84_p11 = por %p83_p10, %p82_p9 }
  0x19   :  { %p85_p12 = pnand %p84_p11, %p78_p8 }
  0x93   :  { %v30_v4 = vpop.permute.xlu0 %29 }
  0x94   :  { %v32_v5 = vadd.f32 %v30_v4, %v24_v2  ;;  %v33_v6 = vadd.f32 %v30_v4, %v25_v3 }
  0x96   :  { %34 = vst [vmem:[#allocation5] sm:$0x3f] %v32_v5  ;;  %35 = vst [vmem:[#allocation5 + $0x8] sm:$0x3f] %v33_v6 }
  0x97   :  { %88 = shalt.err (!%p85_p12)
}
  0x98   :  { %s89_s26 = scalar_lea.hbm %s150_s2, 256 }
  0x99   :  { %p90_p13 = scmp.ne.s32.totalorder %s150_s2, %s89_s26  ;;  %p93_p0 = scmp.lt.u32.totalorder %s89_s26, %s150_s2 }
  0x9b   :  { %p95_p1 = pnand %p93_p0, %p90_p13 }
  0x9d   :  { %98 = shalt.err (!%p95_p1)
}
  0x9e   :  { %45 = dma.vmem_to_hbm [thread:$0]  %s43_s24, 256, %s150_s2, [#allocation4]  }
  0x9f   :  { %101 = dma.done.wait [#allocation4], 256  }
  0xa0   :  { %102 = vsyncadd [#allocation4], 4294967040 }
  0xa1   :  { %49 = vsyncpa [#allocation3], 1 }
  0xa2   :  { %50 = vsyncpa [#allocation4], 1 }

</bundles_post_ra>
